<compile_context>
chip_gen: v7x
topology: tpu7x:2x2x1
jax: 0.10.0
libtpu: 0.0.40
codegen_flags: <defaults>
</compile_context>

<pallas_src>
import functools

import numpy as np
import jax
import jax.numpy as jnp
from jax import lax
from jax.experimental import pallas as pl
from jax.experimental.pallas import tpu as pltpu

LANE = 128


def _round_up(n, m):
    return (n + m - 1) // m * m


def highway_gcn_kernel(x_ref, adj_ref, wcat_ref, bcat_ref, out_ref):
    """One block of Bb graphs per grid step.

    x_ref:    [Bb, N, Dp]   f32, features zero-padded to Dp (lanes d: are 0)
    adj_ref:  [Bb, N, N]    f32 (cast to bf16 in-kernel for the MXU)
    wcat_ref: [Dp, 2*Dp]    bf16 fused [ W^T | K_gate ]  (batch-invariant)
    bcat_ref: [1, 2*Dp]     f32 fused [ bias | bias_gate ]
    out_ref:  [Bb, N, Dp]   f32 (padded lanes come out exactly zero)
    """
    bb, n, dp = out_ref.shape
    compute_dtype = wcat_ref.dtype

    residual = x_ref[...]                                   # [Bb, N, Dp] f32
    x2d = residual.reshape(bb * n, dp).astype(compute_dtype)  # bf16 MXU operand

    # Single fused projection for the whole block:
    #   proj = (Bb*N, Dp) @ [ W^T | K_gate ]  ->  (Bb*N, 2*Dp), f32 accumulation.
    proj = jnp.dot(x2d, wcat_ref[...], preferred_element_type=jnp.float32)
    proj = proj + bcat_ref[...]                             # f32 bias add

    # 128-aligned static slices recover the two halves.
    hidden = proj[:, :dp].astype(compute_dtype).reshape(bb, n, dp)   # x@W^T + b
    gate_lin = proj[:, dp:].reshape(bb, n, dp)                       # x@K + b_g

    # support = relu(adj @ hidden): batched MXU matmul, bf16 operands, f32 acc.
    adj_b = adj_ref[...].astype(compute_dtype)              # in-kernel cast (VPU)
    support = jnp.einsum('bnm,bmd->bnd', adj_b, hidden,
                         preferred_element_type=jnp.float32)
    support = jnp.maximum(support, 0.0)

    # Highway gating: sigmoid on the EUP, blend on the VPU.
    # out = t*support + (1-t)*residual  ==  residual + t*(support - residual)
    t_gate = jax.nn.sigmoid(gate_lin)
    out_ref[...] = residual + t_gate * (support - residual)


def prepare_highway_params(weight, bias, kernel_gate, bias_gate, *, d_pad,
                           compute_dtype=jnp.bfloat16):
    """One-time parameter prep: fuse + pad + cast the weights.

    weight:      [d, d]  nn.Linear layout (out, in)
    kernel_gate: [d, d]  (in, out) layout (x @ K_gate)
    Returns (w_cat [d_pad, 2*d_pad] compute_dtype, b_cat [1, 2*d_pad] f32).
    """
    d = weight.shape[0]
    pad = d_pad - d
    wt = jnp.pad(weight.T, ((0, pad), (0, pad)))            # [Dp, Dp]
    kg = jnp.pad(kernel_gate, ((0, pad), (0, pad)))         # [Dp, Dp]
    w_cat = jnp.concatenate([wt, kg], axis=1).astype(compute_dtype)
    b_cat = jnp.concatenate([jnp.pad(bias, (0, pad)),
                             jnp.pad(bias_gate, (0, pad))]).astype(jnp.float32)
    return w_cat, b_cat.reshape(1, 2 * d_pad)


@functools.partial(jax.jit, static_argnums=(4,))
def _highway_graph_convolution(x, adj, w_cat, b_cat, grid_steps):
    B, N, d = x.shape
    d_pad = w_cat.shape[0]
    Bb = B // grid_steps

    # Lane-dense features: zero-pad d -> Dp in f32 (tiny tensor; the bf16 cast
    # and the cast of the large adj tensor both happen inside the kernel, so
    # adj is read from HBM exactly once).
    x_p = jnp.pad(x, ((0, 0), (0, 0), (0, d_pad - d)))

    flops = int(2 * B * N * d_pad * (2 * d_pad)       # fused projection
                + 2 * B * N * N * d_pad               # adj @ hidden
                + 5 * B * N * d_pad)                  # gating elementwise
    transcendentals = int(B * N * d_pad)              # sigmoid
    bytes_accessed = int(x_p.size * 4                 # x (f32 in)
                         + adj.size * 4               # adj (f32 in)
                         + B * N * d_pad * 4          # out (f32)
                         + w_cat.size * w_cat.dtype.itemsize
                         + b_cat.size * 4)

    out_pad = pl.pallas_call(
        highway_gcn_kernel,
        out_shape=jax.ShapeDtypeStruct((B, N, d_pad), jnp.float32),
        grid=(grid_steps,),
        in_specs=[
            pl.BlockSpec((Bb, N, d_pad), lambda g: (g, 0, 0)),    # x block
            pl.BlockSpec((Bb, N, N), lambda g: (g, 0, 0)),        # adj block
            pl.BlockSpec((d_pad, 2 * d_pad), lambda g: (0, 0)),   # fused weights
            pl.BlockSpec((1, 2 * d_pad), lambda g: (0, 0)),       # fused biases
        ],
        out_specs=pl.BlockSpec((Bb, N, d_pad), lambda g: (g, 0, 0)),
        compiler_params=pltpu.CompilerParams(
            dimension_semantics=("parallel",),
            # Let XLA fuse the (tiny) feature pad into the call's operands.
            allow_input_fusion=[True, True, False, False],
        ),
        cost_estimate=pl.CostEstimate(flops=flops,
                                      transcendentals=transcendentals,
                                      bytes_accessed=bytes_accessed),
    )(x_p, adj, w_cat, b_cat)

    # Lane-dense padded layout is handed to the consumer unchanged: the valid
    # result is out_pad[..., :d]; lanes d: are exactly zero.  (No extra XLA
    # slice pass over the output inside the jit.)
    return out_pad, adj


def highway_graph_convolution(x, adj, w_cat, b_cat, *, grid_steps=None):
    """x: [B, N, d] f32, adj: [B, N, N] f32, fused params from
    prepare_highway_params.  Returns (out_padded [B, N, Dp] f32, adj)."""
    B = x.shape[0]
    if grid_steps is None:
        # 1 step minimizes fixed pipeline overhead on single-TC chips
        # (v5e/v6e); >=2 "parallel" steps let v7x's second TensorCore pick up
        # work.  2 is a reasonable default for even B.
        grid_steps = 2 if (B % 2 == 0 and B >= 2) else 1
    assert B % grid_steps == 0
    return _highway_graph_convolution(x, adj, w_cat, b_cat, grid_steps)


def reference(x, adj, weight, bias, kernel_gate, bias_gate, compute_dtype):
    """Pure-JAX reference mirroring the kernel's mixed-precision numerics."""
    xc = x.astype(compute_dtype).astype(jnp.float32)     # MXU operand rounding
    wc = weight.astype(compute_dtype).astype(jnp.float32)
    kc = kernel_gate.astype(compute_dtype).astype(jnp.float32)
    ac = adj.astype(compute_dtype).astype(jnp.float32)

    hidden = jnp.einsum('bnd,od->bno', xc, wc,
                        precision=lax.Precision.HIGHEST) + bias
    gate_lin = jnp.einsum('bnd,do->bno', xc, kc,
                          precision=lax.Precision.HIGHEST) + bias_gate
    hc = hidden.astype(compute_dtype).astype(jnp.float32)
    support = jnp.maximum(
        jnp.einsum('bnm,bmo->bno', ac, hc, precision=lax.Precision.HIGHEST),
        0.0)
    t = jax.nn.sigmoid(gate_lin)
    return x + t * (support - x)        # residual is the exact f32 x


if __name__ == "__main__":
    B, N, d = 4, 64, 32                 # graphs, nodes, features (in == out)
    compute_dtype = jnp.bfloat16
    key = jax.random.PRNGKey(0)
    kx, ka, kw, kb, kg = jax.random.split(key, 5)

    x = jax.random.normal(kx, (B, N, d), dtype=jnp.float32)

    # symmetric, roughly row-normalized dense adjacency per graph
    a = jax.random.uniform(ka, (B, N, N), dtype=jnp.float32)
    adj = (a + jnp.swapaxes(a, -1, -2)) * 0.5 / N

    # nn.Linear(d, d, bias=True): weight [out, in], bias [out]
    lin_bound = 1.0 / np.sqrt(d)
    weight = jax.random.uniform(kw, (d, d), minval=-lin_bound, maxval=lin_bound,
                                dtype=jnp.float32)
    bias = jax.random.uniform(kb, (d,), minval=-lin_bound, maxval=lin_bound,
                              dtype=jnp.float32)

    # highway gate params: uniform(+-sqrt(6/(d+d))), bias_gate = zeros
    init_range = float(np.sqrt(6.0 / (d + d)))
    kernel_gate = jax.random.uniform(kg, (d, d), minval=-init_range,
                                     maxval=init_range, dtype=jnp.float32)
    bias_gate = jnp.zeros((d,), dtype=jnp.float32)

    d_pad = _round_up(d, LANE)
    w_cat, b_cat = prepare_highway_params(weight, bias, kernel_gate, bias_gate,
                                          d_pad=d_pad,
                                          compute_dtype=compute_dtype)

    out_pad, adj_out = highway_graph_convolution(x, adj, w_cat, b_cat)
    out_pad = jax.block_until_ready(out_pad)

    # Consumer-side view of the padded layout: first d lanes hold the result.
    out = np.asarray(out_pad)[..., :d]

    ref = reference(x, adj, weight, bias, kernel_gate, bias_gate, compute_dtype)
    np.testing.assert_allclose(out, np.asarray(ref), rtol=1e-4, atol=1e-4)
    # padded lanes must be exactly zero
    np.testing.assert_array_equal(np.asarray(out_pad)[..., d:], 0.0)
    print("KERNEL_OK")
</pallas_src>

<mosaic_0001>
module attributes {stable_mosaic.version = 11 : i64} {
  func.func @highway_gcn_kernel(%arg0: i32, %arg1: memref<2x64x128xf32, #tpu.memory_space<vmem>>, %arg2: memref<2x64x64xf32, #tpu.memory_space<vmem>>, %arg3: memref<128x256xbf16, #tpu.memory_space<vmem>>, %arg4: memref<1x256xf32, #tpu.memory_space<vmem>>, %arg5: memref<2x64x128xf32, #tpu.memory_space<vmem>>) attributes {dimension_semantics = [#tpu.dimension_semantics<parallel>], iteration_bounds = array<i64: 2>, scalar_prefetch = 0 : i64, scratch_operands = 0 : i64, tpu.core_type = #tpu.core_type<tc>, window_params = [{transform_indices = @transform_0, window_bounds = array<i64: 2, 64, 128>}, {transform_indices = @transform_1, window_bounds = array<i64: 2, 64, 64>}, {pipeline_mode = #tpu.pipeline_mode<synchronous>, transform_indices = @transform_2, window_bounds = array<i64: 128, 256>}, {pipeline_mode = #tpu.pipeline_mode<synchronous>, transform_indices = @transform_3, window_bounds = array<i64: 1, 256>}, {transform_indices = @transform_4, window_bounds = array<i64: 2, 64, 128>}]} {
    %c0 = arith.constant 0 : index
    %c0_0 = arith.constant 0 : index
    %c0_1 = arith.constant 0 : index
    %0 = vector.load %arg1[%c0, %c0_0, %c0_1] : memref<2x64x128xf32, #tpu.memory_space<vmem>>, vector<2x64x128xf32>
    %1 = vector.shape_cast %0 : vector<2x64x128xf32> to vector<128x128xf32>
    %2 = arith.truncf %1 : vector<128x128xf32> to vector<128x128xbf16>
    %c0_2 = arith.constant 0 : index
    %c0_3 = arith.constant 0 : index
    %3 = vector.load %arg3[%c0_2, %c0_3] : memref<128x256xbf16, #tpu.memory_space<vmem>>, vector<128x256xbf16>
    %cst = arith.constant dense<0.000000e+00> : vector<128x256xf32>
    %4 = tpu.matmul %2, %3, %cst {dimension_numbers = #tpu.dot_dimension_numbers<[1], [0], [0], [1], [0, 0, 1, 1], [], []>} : vector<128x128xbf16>, vector<128x256xbf16>, vector<128x256xf32> -> vector<128x256xf32>
    %c0_4 = arith.constant 0 : index
    %c0_5 = arith.constant 0 : index
    %5 = vector.load %arg4[%c0_4, %c0_5] : memref<1x256xf32, #tpu.memory_space<vmem>>, vector<1x256xf32>
    %6 = vector.broadcast %5 : vector<1x256xf32> to vector<128x256xf32>
    %7 = arith.addf %4, %6 : vector<128x256xf32>
    %8 = vector.extract_strided_slice %7 {offsets = [0, 0], sizes = [128, 128], strides = [1, 1]} : vector<128x256xf32> to vector<128x128xf32>
    %9 = arith.truncf %8 : vector<128x128xf32> to vector<128x128xbf16>
    %10 = vector.shape_cast %9 : vector<128x128xbf16> to vector<2x64x128xbf16>
    %11 = vector.extract_strided_slice %7 {offsets = [0, 128], sizes = [128, 128], strides = [1, 1]} : vector<128x256xf32> to vector<128x128xf32>
    %12 = vector.shape_cast %11 : vector<128x128xf32> to vector<2x64x128xf32>
    %c0_6 = arith.constant 0 : index
    %c0_7 = arith.constant 0 : index
    %c0_8 = arith.constant 0 : index
    %13 = vector.load %arg2[%c0_6, %c0_7, %c0_8] : memref<2x64x64xf32, #tpu.memory_space<vmem>>, vector<2x64x64xf32>
    %14 = arith.truncf %13 : vector<2x64x64xf32> to vector<2x64x64xbf16>
    "tpu.trace_start"() <{level = 10 : i32, message = "bnm,bmd->bnd"}> : () -> ()
    %cst_9 = arith.constant dense<0.000000e+00> : vector<2x64x128xf32>
    %15 = tpu.matmul %14, %10, %cst_9 {dimension_numbers = #tpu.dot_dimension_numbers<[2], [1], [1], [2], [0, 0, 0, 1, 1, 2], [0], [0]>} : vector<2x64x64xbf16>, vector<2x64x128xbf16>, vector<2x64x128xf32> -> vector<2x64x128xf32>
    "tpu.trace_stop"() : () -> ()
    %cst_10 = arith.constant 0.000000e+00 : f32
    %16 = vector.broadcast %cst_10 : f32 to vector<2x64x128xf32>
    %17 = arith.maximumf %15, %16 : vector<2x64x128xf32>
    %18 = arith.negf %12 : vector<2x64x128xf32>
    %19 = math.exp %18 : vector<2x64x128xf32>
    %cst_11 = arith.constant 1.000000e+00 : f32
    %20 = vector.broadcast %cst_11 : f32 to vector<2x64x128xf32>
    %21 = arith.addf %20, %19 : vector<2x64x128xf32>
    %22 = arith.divf %20, %21 : vector<2x64x128xf32>
    %23 = arith.subf %17, %0 : vector<2x64x128xf32>
    %24 = arith.mulf %22, %23 : vector<2x64x128xf32>
    %25 = arith.addf %0, %24 : vector<2x64x128xf32>
    %c0_12 = arith.constant 0 : index
    %c0_13 = arith.constant 0 : index
    %c0_14 = arith.constant 0 : index
    %26 = vector.load %arg5[%c0_12, %c0_13, %c0_14] : memref<2x64x128xf32, #tpu.memory_space<vmem>>, vector<2x64x128xf32>
    tpu.vector_store %arg5[%c0_12, %c0_13, %c0_14], %25 {strides = array<i32>} : memref<2x64x128xf32, #tpu.memory_space<vmem>>, vector<2x64x128xf32>,
    return
  }
  func.func @transform_0(%arg0: i32) -> (i32, i32, i32) {
    %c0_i32 = arith.constant 0 : i32
    %c0_i32_0 = arith.constant 0 : i32
    %c0_i32_1 = arith.constant 0 : i32
    return %arg0, %c0_i32, %c0_i32_0 : i32, i32, i32
  }
  func.func @transform_1(%arg0: i32) -> (i32, i32, i32) {
    %c0_i32 = arith.constant 0 : i32
    %c0_i32_0 = arith.constant 0 : i32
    %c0_i32_1 = arith.constant 0 : i32
    return %arg0, %c0_i32, %c0_i32_0 : i32, i32, i32
  }
  func.func @transform_2(%arg0: i32) -> (i32, i32) {
    %c0_i32 = arith.constant 0 : i32
    %c0_i32_0 = arith.constant 0 : i32
    %c0_i32_1 = arith.constant 0 : i32
    return %c0_i32, %c0_i32_0 : i32, i32
  }
  func.func @transform_3(%arg0: i32) -> (i32, i32) {
    %c0_i32 = arith.constant 0 : i32
    %c0_i32_0 = arith.constant 0 : i32
    %c0_i32_1 = arith.constant 0 : i32
    return %c0_i32, %c0_i32_0 : i32, i32
  }
  func.func @transform_4(%arg0: i32) -> (i32, i32, i32) {
    %c0_i32 = arith.constant 0 : i32
    %c0_i32_0 = arith.constant 0 : i32
    %c0_i32_1 = arith.constant 0 : i32
    return %arg0, %c0_i32, %c0_i32_0 : i32, i32, i32
  }
}

</mosaic_0001>

<bundles_post_ra>
// kernel: _highway_graph_convolution.2
= control target key start
LH: loop header
LB: loop body
LE: loop exit
PB: predicated region body
PF: predicated region fallthrough
CT: control target
= control target key end

     0   :  { %s1921_s0 = inlined_call_operand.vmem [shape: f32[4,64,64], index: 0, kind: input, shape index: {}]   ;;  %s1922_s1 = inlined_call_operand.vmem [shape: bf16[128,256], index: 1, kind: input, shape index: {}]   ;;  %s1923_s2 = inlined_call_operand.vmem [shape: f32[1,256], index: 2, kind: input, shape index: {}]   ;;  %s1924_s3 = inlined_call_operand.vmem [shape: f32[4,64,32], index: 3, kind: input, shape index: {}]   ;;  %s1925_s4 = inlined_call_operand.<no memory space> [shape: f32[], index: 4, kind: input, shape index: {}]   ;;  %s1926_s5 = inlined_call_operand.hbm [shape: f32[4,64,128], index: 5, kind: output, shape index: {}]  }
   0x1   :  { %v1456_v0 = vstv %s1925_s4 }
   0x2   :  { %11 = vsyncpa [#allocation8], 0 }
   0x3   :  { %13 = vsyncpa [#allocation8 + $0x1], 0  ;;  %s1458_s20 = smov 0   ;;  %s1460_s21 = smov 0  }
   0x4   :  { %s1462_s22 = smov 0   ;;  %s1464_s23 = smov 0  }
   0x5 LB: > { %s1479_s4 = sadd.s32 4294967295, %s1417_s23   ;;  %s1085_s24 = sadd.s32 4294967294, %s1417_s23   ;;  %s1417_s23 = sphi %s1464_s23, %s1932_s23   ;;  %s1413_s22 = sphi %s1462_s22, %s1931_s22   ;;  %s1409_s21 = sphi %s1460_s21, %s1930_s21   ;;  %s1405_s20 = sphi %s1458_s20, %s1929_s20  }
   0x6   : > { %s1483_s25 = sadd.s32 1, %s1417_s23   ;;  %s120_s26 = sadd.s32 1, %s1413_s22 }
   0x7   : > { %s117_s27 = ssub.s32 %s1417_s23, %s1483_s25  ;;  %p130_p0 = scmp.ne.s32.totalorder %s1413_s22, %s1409_s21 }
   0x8   : > { %p118_p1 = scmp.eq.s32.totalorder %s117_s27, 0  ;;  %p131_p2 = scmp.eq.s32.totalorder %s1479_s4, 1 }
   0x9   : > { %p136_p3 = scmp.ne.s32.totalorder %s1409_s21, %s1405_s20  ;;  %p137_p4 = scmp.eq.s32.totalorder %s1085_s24, 1 }
   0xa   : > { %s1494_s28 = scalar_select %p118_p1, %s1413_s22, %s120_s26  }
   0xb   : > { %p1496_p5 = por %p131_p2, %p130_p0  ;;  %p1500_p6 = por %p137_p4, %p136_p3 }
   0xc   : > { %p1088_p7 = scmp.ge.s32.totalorder %s1417_s23, 1  ;;  %p181_p8 = scmp.lt.s32.totalorder %s1417_s23, 3 }
   0xe   : > { %p182_p9 = pnand %p1088_p7, %p181_p8 }
   0xf   : > { %v1267_v1 = vld [vmem:[%s1922_s1 + $0x4] ss:$8 sps:$4 sm:$0xff] (!%p182_p9)   ;;  %v1269_v2 = vld [vmem:[%s1922_s1] ss:$8 sps:$4 sm:$0xff] (!%p182_p9)   ;;  %v1419_v3 = vmov (!%p182_p9), 0   ;;  %v230_v5 = vlaneseq (!%p182_p9)  ;;  %s1090_s16 = sshll.u32 (!%p182_p9), %s1479_s4, 1 }
  0x10   : > { %185 = sbr.rel (%p182_p9) target bundleno = 565 (0x235), region = 36  ;;  %552 = vmatprep.mubr.bf16.mxu0 (!%p182_p9), %v1419_v3  ;;  %612 = vmatprep.mubr.bf16.mxu1 (!%p182_p9), %v1419_v3  ;;  %v1270_v4 = vld [vmem:[%s1922_s1 + $0x14] ss:$8 sps:$4 sm:$0xff] (!%p182_p9)   ;;  %v1272_v6 = vld [vmem:[%s1922_s1 + $0x10] ss:$8 sps:$4 sm:$0xff] (!%p182_p9)   ;;  %p215_p10 = scmp.lt.s32.totalorder (!%p182_p9), %s1090_s16, 3 }
  0x11   : > { %520 = vmatprep.subr.bf16.mxu0 (!%p182_p9), %v1267_v1  ;;  %1209 = vmatprep.subr.bf16.mxu1 (!%p182_p9), %v1267_v1  ;;  %v1273_v7 = vld [vmem:[%s1922_s1 + $0x24] ss:$8 sps:$4 sm:$0xff] (!%p182_p9)   ;;  %v1523_v8 = vshrl.u32 (!%p182_p9), %v230_v5, 7  ;;  %v1275_v9 = vld [vmem:[%s1922_s1 + $0x20] ss:$8 sps:$4 sm:$0xff] (!%p182_p9)   ;;  %v1559_v19 = vand.u32 (!%p182_p9), 127, %v230_v5 }
  0x12   : > { %521 = vmatpush1.bf16.msra.mxu0 (!%p182_p9), %v1269_v2  ;;  %1217 = vmatpush1.bf16.msra.mxu1 (!%p182_p9), %v1269_v2  ;;  %v1276_v10 = vld [vmem:[%s1922_s1 + $0x34] ss:$8 sps:$4 sm:$0xff] (!%p182_p9)   ;;  %v1278_v12 = vld [vmem:[%s1922_s1 + $0x30] ss:$8 sps:$4 sm:$0xff] (!%p182_p9)   ;;  %v1539_v13 = vld [vmem:[%s1923_s2] sm:$0x3] (!%p182_p9) }
  0x13   : > { %522 = vmatprep.subr.bf16.mxu0 (!%p182_p9), %v1270_v4  ;;  %1210 = vmatprep.subr.bf16.mxu1 (!%p182_p9), %v1270_v4  ;;  %v436_v11 = vsub.s32 (!%p182_p9), 1, %v1523_v8  ;;  %v1279_v14 = vld [vmem:[%s1922_s1 + $0x44] ss:$8 sps:$4 sm:$0xff] (!%p182_p9)   ;;  %v1281_v16 = vld [vmem:[%s1922_s1 + $0x40] ss:$8 sps:$4 sm:$0xff] (!%p182_p9)   ;;  %vm233_vm0 = vcmp.lt.s32.totalorder (!%p182_p9), %v1559_v19, 32 }
  0x14   : > { %v1282_v17 = vld [vmem:[%s1922_s1 + $0x54] ss:$8 sps:$4 sm:$0xff] (!%p182_p9)   ;;  %v1284_v18 = vld [vmem:[%s1922_s1 + $0x50] ss:$8 sps:$4 sm:$0xff] (!%p182_p9)   ;;  %v1285_v20 = vld [vmem:[%s1922_s1 + $0x64] ss:$8 sps:$4 sm:$0xff] (!%p182_p9)  }
  0x15   : > { %v1545_v15 = vrot.slane (!%p182_p9), %v1539_v13, %v436_v11  ;;  %v1287_v21 = vld [vmem:[%s1922_s1 + $0x60] ss:$8 sps:$4 sm:$0xff] (!%p182_p9)   ;;  %v1288_v22 = vld [vmem:[%s1922_s1 + $0x74] ss:$8 sps:$4 sm:$0xff] (!%p182_p9)   ;;  %v1290_v28 = vld [vmem:[%s1922_s1 + $0x70] ss:$8 sps:$4 sm:$0xff] (!%p182_p9)  }
  0x16   : > { %523 = vmatpush1.bf16.msra.mxu0 (!%p182_p9), %v1272_v6  ;;  %1218 = vmatpush1.bf16.msra.mxu1 (!%p182_p9), %v1272_v6  ;;  %vm665_vm1 = vcmask (!%p182_p9), 523264   ;;  %v432_v4 = vsub.s32 (!%p182_p9), 0, %v1523_v8  ;;  %s1160_s18 = sshll.u32 (!%p182_p9), %s1479_s4, 11  ;;  %s1420_s7 = smov (!%p182_p9), [#allocation7]  }
  0x17   : > { %524 = vmatprep.subr.bf16.mxu0 %v1273_v7  ;;  %1211 = vmatprep.subr.bf16.mxu1 %v1273_v7  ;;  %s1934_s16 = smov (!%p215_p10, %s1090_s16), 3  ;;  %s1359_s8 = sshll.u32 %s1420_s7, 4  ;;  %s1360_s8 = int_to_ptr.vmem [resolvable:$false] %s1359_s8 }
  0x18   : > { %s1157_s14 = sshll.u32 %s1934_s16, 6  ;;  %v1711_v5 = vrot.slane %v1539_v13, %v432_v4  ;;  %s211_s16 = sand.u32 1, %s1409_s21  }
  0x19   : > { %s1569_s27 = scalar_lea.vmem %s1924_s3, %s1157_s14  ;;  %s1704_s15 = scalar_lea.vmem %s1921_s0, %s1157_s14 }
  0x1a   : > { %525 = vmatpush1.bf16.msra.mxu0 %v1275_v9  ;;  %1219 = vmatpush1.bf16.msra.mxu1 %v1275_v9  ;;  %v229_v23 = vld [vmem:[%s1569_s27] sm:$0xff]  ;;  %v1096_v24 = vld [vmem:[%s1569_s27 + $0x8] sm:$0xff]  ;;  %v1097_v34 = vld [vmem:[%s1569_s27 + $0x10] sm:$0xff]  ;;  %s1089_s14 = sshll.u32 %s211_s16, 7  ;;  %s1880_s4 = scalar_lea.sflag [#allocation8], %s211_s16 }
  0x1b   : > { %526 = vmatprep.subr.bf16.mxu0 %v1276_v10  ;;  %1212 = vmatprep.subr.bf16.mxu1 %v1276_v10  ;;  %v1107_v25 = vld [vmem:[%s1569_s27 + $0x60] sm:$0xff]  ;;  %v1108_v26 = vld [vmem:[%s1569_s27 + $0x68] sm:$0xff]  ;;  %v1585_v27 = vsel %vm233_vm0, %v229_v23, %v1456_v0  ;;  %v1593_v29 = vsel %vm233_vm0, %v1096_v24, %v1456_v0  ;;  %v1098_v35 = vld [vmem:[%s1569_s27 + $0x18] sm:$0xff]  ;;  %v1616_v38 = vsel %vm233_vm0, %v1097_v34, %v1456_v0  ;;  %s1825_s17 = scalar_lea.vmem [#allocation7], %s1089_s14  ;;  %s1361_s9 = scalar_lea.vmem %s1360_s8, 4096 }
  0x1c   : > { %v1598_v30 = vsel %vm233_vm0, %v1107_v25, %v1456_v0  ;;  %v1603_v31 = vsel %vm233_vm0, %v1108_v26, %v1456_v0  ;;  %v404_v32 = vpack.c.bf16 %v1593_v29, %v1585_v27  ;;  %v1109_v36 = vld [vmem:[%s1569_s27 + $0x70] sm:$0xff]  ;;  %v1110_v37 = vld [vmem:[%s1569_s27 + $0x78] sm:$0xff]  ;;  %v1622_v39 = vsel %vm233_vm0, %v1098_v35, %v1456_v0  ;;  %v1099_v44 = vld [vmem:[%s1569_s27 + $0x20] sm:$0xff]  ;;  %s1011_s19 = sshll.u32 %s1825_s17, 4  ;;  %s1872_s19 = int_to_ptr.vmem [resolvable:$true] %s1011_s19 }
  0x1d   : > { %v410_v33 = vpack.c.bf16 %v1603_v31, %v1598_v30  ;;  %v1628_v40 = vsel %vm233_vm0, %v1109_v36, %v1456_v0  ;;  %v1633_v41 = vsel %vm233_vm0, %v1110_v37, %v1456_v0  ;;  %v405_v42 = vpack.c.bf16 %v1622_v39, %v1616_v38  ;;  %v1100_v45 = vld [vmem:[%s1569_s27 + $0x28] sm:$0xff]  ;;  %v1101_v49 = vld [vmem:[%s1569_s27 + $0x30] sm:$0xff]  ;;  %v1102_v50 = vld [vmem:[%s1569_s27 + $0x38] sm:$0xff]  ;;  %s1355_s6 = scalar_lea.vmem %s1872_s19, 2048  ;;  %p1362_p0 = scmp.lt.s32.totalorder %s1872_s19, %s1360_s8 }
  0x1e   : > { %527 = vmatpush1.bf16.msra.mxu0 %v1278_v12  ;;  %1220 = vmatpush1.bf16.msra.mxu1 %v1278_v12  ;;  %v411_v43 = vpack.c.bf16 %v1633_v41, %v1628_v40  ;;  %v1645_v46 = vsel %vm233_vm0, %v1099_v44, %v1456_v0  ;;  %v1650_v47 = vsel %vm233_vm0, %v1100_v45, %v1456_v0  ;;  %v1103_v54 = vld [vmem:[%s1569_s27 + $0x40] sm:$0xff]  ;;  %v1104_v55 = vld [vmem:[%s1569_s27 + $0x48] sm:$0xff]  ;;  %v1105_v59 = vld [vmem:[%s1569_s27 + $0x50] sm:$0xff]  ;;  %p1356_p11 = scmp.ne.s32.totalorder %s1872_s19, %s1355_s6  ;;  %p1363_p1 = scmp.lt.s32.totalorder %s1361_s9, %s1355_s6 }
  0x1f   : > { %528 = vmatprep.subr.bf16.mxu0 %v1279_v14  ;;  %1213 = vmatprep.subr.bf16.mxu1 %v1279_v14  ;;  %v406_v48 = vpack.c.bf16 %v1650_v47, %v1645_v46  ;;  %v1660_v51 = vsel %vm233_vm0, %v1101_v49, %v1456_v0  ;;  %v1665_v52 = vsel %vm233_vm0, %v1102_v50, %v1456_v0  ;;  %v1106_v60 = vld [vmem:[%s1569_s27 + $0x58] sm:$0xff]  ;;  %v641_v1 = vld [vmem:[%s1704_s15] sm:$0xff]  ;;  %v642_v2 = vld [vmem:[%s1704_s15 + $0x8] sm:$0xff]  ;;  %s1870_s27 = scalar_lea.hbm %s1926_s5, %s1160_s18 }
  0x20   : > { %v407_v53 = vpack.c.bf16 %v1665_v52, %v1660_v51  ;;  %v1675_v56 = vsel %vm233_vm0, %v1103_v54, %v1456_v0  ;;  %v1680_v57 = vsel %vm233_vm0, %v1104_v55, %v1456_v0  ;;  %v1690_v61 = vsel %vm233_vm0, %v1105_v59, %v1456_v0  ;;  %p1357_p12 = pnand %p1356_p11, %p1496_p5  ;;  %p1364_p2 = por %p1363_p1, %p1362_p0 }
  0x21   : > { %v408_v58 = vpack.c.bf16 %v1680_v57, %v1675_v56  ;;  %v1695_v62 = vsel %vm233_vm0, %v1106_v60, %v1456_v0 }
  0x22   : > { %529 = vmatpush1.bf16.msra.mxu0 %v1281_v16  ;;  %1221 = vmatpush1.bf16.msra.mxu1 %v1281_v16  ;;  %v409_v63 = vpack.c.bf16 %v1695_v62, %v1690_v61  ;;  %p1358_p13 = pneg %p1357_p12 }
  0x23   : > { %530 = vmatprep.subr.bf16.mxu0 %v1282_v17  ;;  %1214 = vmatprep.subr.bf16.mxu1 %v1282_v17 }
  0x24   : > { %p1365_p3 = pnand %p1364_p2, %p1358_p13 }
  0x26   : > { %531 = vmatpush1.bf16.msra.mxu0 %v1284_v18  ;;  %1222 = vmatpush1.bf16.msra.mxu1 %v1284_v18 }
  0x27   : > { %532 = vmatprep.subr.bf16.mxu0 %v1285_v20  ;;  %1215 = vmatprep.subr.bf16.mxu1 %v1285_v20 }
  0x2a   : > { %533 = vmatpush1.bf16.msra.mxu0 %v1287_v21  ;;  %1223 = vmatpush1.bf16.msra.mxu1 %v1287_v21 }
  0x2b   : > { %534 = vmatprep.subr.bf16.mxu0 %v1288_v22  ;;  %1216 = vmatprep.subr.bf16.mxu1 %v1288_v22 }
  0x2e   : > { %535 = vmatpush1.bf16.msra.mxu0 %v1290_v28  ;;  %1224 = vmatpush1.bf16.msra.mxu1 %v1290_v28 }
  0x31   : > { %553 = vmatmul.mubr.bf16.vlgmr.msra.gmra.mrb[0].mxu0 %v404_v32  ;;  %613 = vmatmul.mubr.bf16.vlgmr.msra.gmra.mrb[0].mxu1 %v410_v33 }
  0x32   : > { %562 = vmatprep.mubr.bf16.mxu0 %v1419_v3  ;;  %622 = vmatprep.mubr.bf16.mxu1 %v1419_v3 }
  0x39   : > { %563 = vmatmul.mubr.bf16.gmra.mrb[4].mxu0 %v405_v42  ;;  %623 = vmatmul.mubr.bf16.gmra.mrb[4].mxu1 %v411_v43 }
  0x3a   : > { %572 = vmatprep.mubr.bf16.mxu0 %v1419_v3 }
  0x41   : > { %573 = vmatmul.mubr.bf16.gmra.mrb[8].mxu0 %v406_v48 }
  0x42   : > { %582 = vmatprep.mubr.bf16.mxu0 %v1419_v3 }
  0x49   : > { %583 = vmatmul.mubr.bf16.gmra.mrb[12].mxu0 %v407_v53 }
  0x4a   : > { %592 = vmatprep.mubr.bf16.mxu0 %v1419_v3 }
  0x51   : > { %593 = vmatmul.mubr.bf16.gmra.mrb[16].mxu0 %v408_v58 }
  0x52   : > { %602 = vmatprep.mubr.bf16.mxu0 %v1419_v3  ;;  %v657_v3 = vpack.c.bf16 %v642_v2, %v641_v1 }
  0x54   : > { %1185 = vmatprep.mubr.msk.bf16.mxu1 %vm665_vm1, %v657_v3 }
  0x59   : > { %603 = vmatmul.mubr.bf16.gmra.mrb[20].mxu0 %v409_v63 }
 0x104   : > { %v554_v6 = vpop.f32.mrb[0].mxu0  ;;  %v614_v7 = vpop.f32.mrb[0].mxu1 }
 0x105   : > { %v555_v9 = vadd.f32 %v554_v6, %v1711_v5  ;;  %v556_v10 = vpop.f32.mrb[1].mxu0  ;;  %v615_v11 = vadd.f32 %v614_v7, %v1711_v5  ;;  %v616_v12 = vpop.f32.mrb[1].mxu1 }
 0x106   : > { %v1716_v14 = vadd.f32 %v556_v10, %v1545_v15  ;;  %v558_v16 = vpop.f32.mrb[2].mxu0  ;;  %v1719_v17 = vadd.f32 %v616_v12, %v1545_v15  ;;  %v618_v18 = vpop.f32.mrb[2].mxu1 }
 0x107   : > { %v559_v8 = vadd.f32 %v558_v16, %v1711_v5  ;;  %v560_v13 = vpop.f32.mrb[3].mxu0  ;;  %v619_v19 = vadd.f32 %v618_v18, %v1711_v5  ;;  %v620_v20 = vpop.f32.mrb[3].mxu1 }
 0x108   : > { %v1724_v21 = vadd.f32 %v560_v13, %v1545_v15  ;;  %v1727_v22 = vadd.f32 %v620_v20, %v1545_v15  ;;  %v644_v13 = vld [vmem:[%s1704_s15 + $0x18] sm:$0xff]  ;;  %v645_v20 = vld [vmem:[%s1704_s15 + $0x20] sm:$0xff] }
 0x109   : > { %v633_v23 = vpack.c.bf16 %v559_v8, %v555_v9  ;;  %v1729_v24 = vpack.c.bf16 %v619_v19, %v615_v11  ;;  %v643_v8 = vld [vmem:[%s1704_s15 + $0x10] sm:$0xff] }
 0x10b   : > { %1177 = vmatprep.subr.bf16.mxu1 %v633_v23 }
 0x10c   : > { %v564_v25 = vpop.f32.mrb[4].mxu0  ;;  %1178 = vmatpush3.bf16.msra.mxu1 %v633_v23  ;;  %v624_v26 = vpop.f32.mrb[4].mxu1  ;;  %v646_v23 = vld [vmem:[%s1704_s15 + $0x28] sm:$0xff] }
 0x10d   : > { %v565_v28 = vadd.f32 %v564_v25, %v1711_v5  ;;  %v566_v32 = vpop.f32.mrb[5].mxu0  ;;  %v625_v33 = vadd.f32 %v624_v26, %v1711_v5  ;;  %v626_v34 = vpop.f32.mrb[5].mxu1  ;;  %v658_v25 = vpack.c.bf16 %v644_v13, %v643_v8  ;;  %v651_v8 = vld [vmem:[%s1704_s15 + $0x50] sm:$0xff]  ;;  %v652_v13 = vld [vmem:[%s1704_s15 + $0x58] sm:$0xff] }
 0x10e   : > { %v1734_v35 = vadd.f32 %v566_v32, %v1545_v15  ;;  %v568_v36 = vpop.f32.mrb[6].mxu0  ;;  %v1737_v37 = vadd.f32 %v626_v34, %v1545_v15  ;;  %v628_v42 = vpop.f32.mrb[6].mxu1 }
 0x10f   : > { %v569_v43 = vadd.f32 %v568_v36, %v1711_v5  ;;  %v570_v44 = vpop.f32.mrb[7].mxu0  ;;  %v629_v45 = vadd.f32 %v628_v42, %v1711_v5  ;;  %v630_v48 = vpop.f32.mrb[7].mxu1 }
 0x110   : > { %v1742_v49 = vadd.f32 %v570_v44, %v1545_v15  ;;  %v1745_v50 = vadd.f32 %v630_v48, %v1545_v15  ;;  %v648_v48 = vld [vmem:[%s1704_s15 + $0x38] sm:$0xff] }
 0x111   : > { %v634_v53 = vpack.c.bf16 %v569_v43, %v565_v28  ;;  %v1747_v54 = vpack.c.bf16 %v629_v45, %v625_v33  ;;  %v659_v28 = vpack.c.bf16 %v646_v23, %v645_v20  ;;  %v647_v45 = vld [vmem:[%s1704_s15 + $0x30] sm:$0xff]  ;;  %v662_v20 = vpack.c.bf16 %v652_v13, %v651_v8 }
 0x112   : > { %v655_v23 = vld [vmem:[%s1704_s15 + $0x70] sm:$0xff] }
 0x113   : > { %1179 = vmatprep.subr.bf16.mxu1 %v634_v53 }
 0x114   : > { %v574_v55 = vpop.f32.mrb[8].mxu0  ;;  %1180 = vmatpush3.bf16.msra.mxu1 %v634_v53 }
 0x115   : > { %v575_v58 = vadd.f32 %v574_v55, %v1711_v5  ;;  %v576_v59 = vpop.f32.mrb[9].mxu0  ;;  %v649_v55 = vld [vmem:[%s1704_s15 + $0x40] sm:$0xff] }
 0x116   : > { %v1751_v60 = vadd.f32 %v576_v59, %v1545_v15  ;;  %v578_v63 = vpop.f32.mrb[10].mxu0  ;;  %v660_v59 = vpack.c.bf16 %v648_v48, %v647_v45 }
 0x117   : > { %v579_v1 = vadd.f32 %v578_v63, %v1711_v5  ;;  %v580_v2 = vpop.f32.mrb[11].mxu0 }
 0x118   : > { %v1755_v3 = vadd.f32 %v580_v2, %v1545_v15 }
 0x119   : > { %v635_v4 = vpack.c.bf16 %v579_v1, %v575_v58  ;;  %v650_v58 = vld [vmem:[%s1704_s15 + $0x48] sm:$0xff] }
 0x11a   : > { %v661_v1 = vpack.c.bf16 %v650_v58, %v649_v55 }
 0x11b   : > { %1181 = vmatprep.subr.bf16.mxu1 %v635_v4 }
 0x11c   : > { %v584_v6 = vpop.f32.mrb[12].mxu0  ;;  %1182 = vmatpush3.bf16.msra.mxu1 %v635_v4 }
 0x11d   : > { %v585_v7 = vadd.f32 %v584_v6, %v1711_v5  ;;  %v586_v9 = vpop.f32.mrb[13].mxu0 }
 0x11e   : > { %v1759_v10 = vadd.f32 %v586_v9, %v1545_v15  ;;  %v588_v11 = vpop.f32.mrb[14].mxu0 }
 0x11f   : > { %v589_v12 = vadd.f32 %v588_v11, %v1711_v5  ;;  %v590_v16 = vpop.f32.mrb[15].mxu0 }
 0x120   : > { %v1763_v18 = vadd.f32 %v590_v16, %v1545_v15 }
 0x121   : > { %v636_v19 = vpack.c.bf16 %v589_v12, %v585_v7 }
 0x123   : > { %1183 = vmatprep.subr.bf16.mxu1 %v636_v19 }
 0x124   : > { %v594_v26 = vpop.f32.mrb[16].mxu0  ;;  %1184 = vmatpush3.bf16.msra.mxu1 %v636_v19  ;;  %v654_v19 = vld [vmem:[%s1704_s15 + $0x68] sm:$0xff] }
 0x125   : > { %v595_v32 = vadd.f32 %v594_v26, %v1711_v5  ;;  %v596_v33 = vpop.f32.mrb[17].mxu0 }
 0x126   : > { %v1771_v34 = vadd.f32 %v596_v33, %v1545_v15  ;;  %v598_v36 = vpop.f32.mrb[18].mxu0  ;;  %v1136_v33 = vmul.f32 -1.442695, %v1724_v21 }
 0x127   : > { %v599_v42 = vadd.f32 %v598_v36, %v1711_v5  ;;  %v600_v43 = vpop.f32.mrb[19].mxu0  ;;  %1186 = vmatmul.mubr.msk.bf16.vlgmr.msra.gmra.mrb[8].mxu1 %vm665_vm1, %v658_v25  ;;  %v656_v25 = vld [vmem:[%s1704_s15 + $0x78] sm:$0xff]  ;;  %v1141_v36 = vmul.f32 -1.442695, %v1759_v10 }
 0x128   : > { %v1776_v44 = vadd.f32 %v600_v43, %v1545_v15  ;;  %1189 = vmatprep.mubr.msk.bf16.mxu1 %vm665_vm1, %v659_v28  ;;  %v664_v26 = vpack.c.bf16 %v656_v25, %v655_v23  ;;  %v1135_v28 = vmul.f32 -1.442695, %v1716_v14  ;;  %v1140_v43 = vmul.f32 -1.442695, %v1755_v3 }
 0x129   : > { %v637_v53 = vpack.c.bf16 %v599_v42, %v595_v32  ;;  %v1138_v32 = vmul.f32 -1.442695, %v1742_v49  ;;  %v1142_v42 = vmul.f32 -1.442695, %v1763_v18  ;;  %v1143_v18 = vmul.f32 -1.442695, %v1771_v34 }
 0x12a   : > { %v1144_v3 = vmul.f32 -1.442695, %v1776_v44  ;;  %v1149_v23 = vmul.f32 -1.442695, %v1737_v37 }
 0x12b   : > { %1193 = vmatprep.subr.bf16.mxu1 %v637_v53 }
 0x12c   : > { %v604_v63 = vpop.f32.mrb[20].mxu0  ;;  %1194 = vmatpush3.bf16.msra.mxu1 %v637_v53 }
 0x12d   : > { %v605_v2 = vadd.f32 %v604_v63, %v1711_v5  ;;  %v606_v4 = vpop.f32.mrb[21].mxu0 }
 0x12e   : > { %v607_v6 = vadd.f32 %v606_v4, %v1545_v15  ;;  %v608_v7 = vpop.f32.mrb[22].mxu0 }
 0x12f   : > { %v609_v9 = vadd.f32 %v608_v7, %v1711_v5  ;;  %v610_v11 = vpop.f32.mrb[23].mxu0  ;;  %1190 = vmatmul.mubr.msk.bf16.gmra.mrb[12].mxu1 %vm665_vm1, %v660_v59  ;;  %v653_v5 = vld [vmem:[%s1704_s15 + $0x60] sm:$0xff] }
 0x130   : > { %v611_v12 = vadd.f32 %v610_v11, %v1545_v15  ;;  %1201 = vmatprep.mubr.msk.bf16.mxu1 %vm665_vm1, %v661_v1  ;;  %v663_v15 = vpack.c.bf16 %v654_v19, %v653_v5  ;;  %v1145_v63 = vmul.f32 -1.442695, %v607_v6 }
 0x131   : > { %v638_v16 = vpack.c.bf16 %v609_v9, %v605_v2 }
 0x132   : > { %v1146_v4 = vmul.f32 -1.442695, %v611_v12 }
 0x133   : > { %1195 = vmatprep.subr.bf16.mxu1 %v638_v16 }
 0x134   : > { %1196 = vmatpush3.bf16.msra.mxu1 %v638_v16 }
 0x135   : > { %1197 = vmatprep.subr.bf16.mxu1 %v1729_v24 }
 0x138   : > { %1198 = vmatpush3.bf16.msra.mxu1 %v1729_v24  ;;  %v1137_v24 = vmul.f32 -1.442695, %v1734_v35 }
 0x139   : > { %1199 = vmatprep.subr.bf16.mxu1 %v1747_v54 }
 0x13a   : > { %1291 = vpow2.f32 %v1137_v24 }
 0x13b   : > { %1293 = vpow2.f32 %v1135_v28  ;;  %v1147_v28 = vmul.f32 -1.442695, %v1719_v17 }
 0x13c   : > { %1200 = vmatpush3.bf16.msra.mxu1 %v1747_v54  ;;  %v1139_v54 = vmul.f32 -1.442695, %v1751_v60  ;;  %1295 = vpow2.f32 %v1138_v32 }
 0x13d   : > { %1297 = vpow2.f32 %v1136_v33 }
 0x13e   : > { %1299 = vpow2.f32 %v1139_v54 }
 0x13f   : > { %1202 = vmatmul.mubr.msk.bf16.vlgmr.msra.gmra.mrb[16].mxu1 %vm665_vm1, %v662_v20  ;;  %1301 = vpow2.f32 %v1141_v36  ;;  %v1150_v36 = vmul.f32 -1.442695, %v1745_v50 }
 0x140   : > { %1205 = vmatprep.mubr.msk.bf16.mxu1 %vm665_vm1, %v663_v15  ;;  %1303 = vpow2.f32 %v1142_v42 }
 0x141   : > { %1305 = vpow2.f32 %v1140_v43 }
 0x144   : > { %v1292_v35 = vpop.eup %1291 }
 0x145   : > { %v1294_v14 = vpop.eup %1293  ;;  %v886_v45 = vadd.f32 1.0, %v1292_v35 }
 0x146   : > { %v1296_v49 = vpop.eup %1295  ;;  %v884_v60 = vadd.f32 1.0, %v1294_v14  ;;  %v1148_v14 = vmul.f32 -1.442695, %v1727_v22 }
 0x147   : > { %1206 = vmatmul.mubr.msk.bf16.gmra.mrb[20].mxu1 %vm665_vm1, %v664_v26  ;;  %v1298_v21 = vpop.eup %1297  ;;  %v887_v53 = vadd.f32 1.0, %v1296_v49  ;;  %1307 = vrcp.f32 %v886_v45 }
 0x148   : > { %v1300_v48 = vpop.eup %1299  ;;  %v885_v55 = vadd.f32 1.0, %v1298_v21  ;;  %1309 = vrcp.f32 %v884_v60 }
 0x149   : > { %v888_v58 = vadd.f32 1.0, %v1300_v48  ;;  %v1302_v10 = vpop.eup %1301  ;;  %1311 = vrcp.f32 %v887_v53 }
 0x14a   : > { %v1304_v59 = vpop.eup %1303  ;;  %1313 = vrcp.f32 %v885_v55  ;;  %v890_v2 = vadd.f32 1.0, %v1302_v10 }
 0x14b   : > { %v1306_v1 = vpop.eup %1305  ;;  %1315 = vrcp.f32 %v888_v58  ;;  %v891_v7 = vadd.f32 1.0, %v1304_v59 }
 0x14c   : > { %1317 = vpow2.f32 %v1143_v18  ;;  %v889_v11 = vadd.f32 1.0, %v1306_v1 }
 0x14d   : > { %1319 = vpow2.f32 %v1144_v3 }
 0x14e   : > { %1321 = vpow2.f32 %v1145_v63 }
 0x14f   : > { %1323 = vrcp.f32 %v890_v2 }
 0x150   : > { %1325 = vpow2.f32 %v1146_v4 }
 0x151   : > { %v1308_v19 = vpop.eup %1307  ;;  %1327 = vrcp.f32 %v891_v7 }
 0x152   : > { %v1310_v15 = vpop.eup %1309  ;;  %1329 = vrcp.f32 %v889_v11 }
 0x153   : > { %v1312_v24 = vpop.eup %1311  ;;  %1331 = vpow2.f32 %v1149_v23 }
 0x154   : > { %v1314_v54 = vpop.eup %1313  ;;  %1333 = vpow2.f32 %v1147_v28 }
 0x155   : > { %v1316_v35 = vpop.eup %1315  ;;  %1335 = vpow2.f32 %v1150_v36 }
 0x156   : > { %v1318_v45 = vpop.eup %1317  ;;  %1337 = vpow2.f32 %v1148_v14 }
 0x157   : > { %v1320_v48 = vpop.eup %1319  ;;  %v892_v11 = vadd.f32 1.0, %v1318_v45 }
 0x158   : > { %v1322_v53 = vpop.eup %1321 }
 0x159   : > { %v1324_v18 = vpop.eup %1323  ;;  %v894_v2 = vadd.f32 1.0, %v1322_v53 }
 0x15a   : > { %v1326_v59 = vpop.eup %1325 }
 0x15b   : > { %v1328_v1 = vpop.eup %1327  ;;  %1339 = vrcp.f32 %v894_v2 }
 0x15c   : > { %1341 = vrcp.f32 %v892_v11 }
 0x1fa   : > { %v1187_v9 = vpop.f32.mrb[8].mxu1 }
 0x1fb   : > { %v822_v16 = vmax.f32 %v1187_v9, 0.0  ;;  %v712_v34 = vpop.f32.mrb[9].mxu1  ;;  %v1330_v9 = vpop.eup %1329 }
 0x1fc   : > { %v820_v8 = vmax.f32 %v712_v34, 0.0  ;;  %v1188_v44 = vpop.f32.mrb[10].mxu1 }
 0x1fd   : > { %v934_v6 = vsub.f32 %v822_v16, %v1616_v38  ;;  %v823_v13 = vmax.f32 %v1188_v44, 0.0  ;;  %v715_v5 = vpop.f32.mrb[11].mxu1 }
 0x1fe   : > { %v932_v12 = vsub.f32 %v820_v8, %v1585_v27  ;;  %v821_v20 = vmax.f32 %v715_v5, 0.0  ;;  %v895_v8 = vadd.f32 1.0, %v1326_v59 }
 0x1ff   : > { %v950_v25 = vmul.f32 %v1308_v19, %v934_v6  ;;  %v935_v26 = vsub.f32 %v823_v13, %v1622_v39  ;;  %v893_v13 = vadd.f32 1.0, %v1320_v48 }
 0x200   : > { %v948_v32 = vmul.f32 %v1310_v15, %v932_v12  ;;  %v933_v33 = vsub.f32 %v821_v20, %v1593_v29  ;;  %v1332_v12 = vpop.eup %1331  ;;  %1343 = vrcp.f32 %v895_v8 }
 0x201   : > { %v966_v42 = vadd.f32 %v950_v25, %v1616_v38  ;;  %v951_v43 = vmul.f32 %v1312_v24, %v935_v26  ;;  %v1334_v20 = vpop.eup %1333  ;;  %1345 = vrcp.f32 %v893_v13  ;;  %v898_v23 = vadd.f32 1.0, %v1332_v12 }
 0x202   : > { %v964_v37 = vadd.f32 %v948_v32, %v1585_v27  ;;  %v949_v49 = vmul.f32 %v1314_v54, %v933_v33  ;;  %v1191_v21 = vpop.f32.mrb[12].mxu1 }
 0x203   : > { %982 = vst [vmem:[%s1825_s17 + $0x10] sm:$0xff] %v966_v42  ;;  %v967_v17 = vadd.f32 %v951_v43, %v1622_v39  ;;  %v826_v50 = vmax.f32 %v1191_v21, 0.0  ;;  %v728_v38 = vpop.f32.mrb[13].mxu1  ;;  %1347 = vrcp.f32 %v898_v23 }
 0x204   : > { %980 = vst [vmem:[%s1825_s17] sm:$0xff] %v964_v37  ;;  %v965_v27 = vadd.f32 %v949_v49, %v1593_v29  ;;  %v824_v22 = vmax.f32 %v728_v38, 0.0  ;;  %v1192_v60 = vpop.f32.mrb[14].mxu1 }
 0x205   : > { %983 = vst [vmem:[%s1825_s17 + $0x18] sm:$0xff] %v967_v17  ;;  %v938_v55 = vsub.f32 %v826_v50, %v1660_v51  ;;  %v827_v58 = vmax.f32 %v1192_v60, 0.0  ;;  %v731_v10 = vpop.f32.mrb[15].mxu1 }
 0x206   : > { %981 = vst [vmem:[%s1825_s17 + $0x8] sm:$0xff] %v965_v27  ;;  %v936_v39 = vsub.f32 %v824_v22, %v1645_v46  ;;  %v825_v3 = vmax.f32 %v731_v10, 0.0 }
 0x207   : > { %v954_v63 = vmul.f32 %v1324_v18, %v938_v55  ;;  %v939_v29 = vsub.f32 %v827_v58, %v1665_v52 }
 0x208   : > { %v952_v4 = vmul.f32 %v1316_v35, %v936_v39  ;;  %v937_v7 = vsub.f32 %v825_v3, %v1650_v47 }
 0x209   : > { %v970_v16 = vadd.f32 %v954_v63, %v1660_v51  ;;  %v955_v34 = vmul.f32 %v1328_v1, %v939_v29  ;;  %v1336_v51 = vpop.eup %1335 }
 0x20a   : > { %v968_v44 = vadd.f32 %v952_v4, %v1645_v46  ;;  %v953_v6 = vmul.f32 %v1330_v9, %v937_v7  ;;  %v1338_v15 = vpop.eup %1337  ;;  %v896_v46 = vadd.f32 1.0, %v1334_v20  ;;  %v899_v25 = vadd.f32 1.0, %v1336_v51 }
 0x20b   : > { %986 = vst [vmem:[%s1825_s17 + $0x30] sm:$0xff] %v970_v16  ;;  %v971_v5 = vadd.f32 %v955_v34, %v1665_v52  ;;  %v897_v24 = vadd.f32 1.0, %v1338_v15  ;;  %v1340_v42 = vpop.eup %1339 }
 0x20c   : > { %984 = vst [vmem:[%s1825_s17 + $0x20] sm:$0xff] %v968_v44  ;;  %v969_v19 = vadd.f32 %v953_v6, %v1650_v47  ;;  %1349 = vrcp.f32 %v896_v46  ;;  %v1342_v14 = vpop.eup %1341 }
 0x20d   : > { %987 = vst [vmem:[%s1825_s17 + $0x38] sm:$0xff] %v971_v5  ;;  %1351 = vrcp.f32 %v899_v25  ;;  %v1344_v21 = vpop.eup %1343 }
 0x20e   : > { %985 = vst [vmem:[%s1825_s17 + $0x28] sm:$0xff] %v969_v19  ;;  %1353 = vrcp.f32 %v897_v24  ;;  %v1346_v50 = vpop.eup %1345 }
 0x20f   : > { %v1348_v59 = vpop.eup %1347 }
 0x212   : > { %v1203_v26 = vpop.f32.mrb[16].mxu1 }
 0x213   : > { %v830_v28 = vmax.f32 %v1203_v26, 0.0  ;;  %v789_v52 = vpop.f32.mrb[17].mxu1 }
 0x214   : > { %v828_v32 = vmax.f32 %v789_v52, 0.0  ;;  %v1204_v33 = vpop.f32.mrb[18].mxu1 }
 0x215   : > { %v942_v47 = vsub.f32 %v830_v28, %v1690_v61  ;;  %v831_v54 = vmax.f32 %v1204_v33, 0.0  ;;  %v792_v36 = vpop.f32.mrb[19].mxu1 }
 0x216   : > { %v940_v43 = vsub.f32 %v828_v32, %v1675_v56  ;;  %v829_v35 = vmax.f32 %v792_v36, 0.0  ;;  %v1350_v29 = vpop.eup %1349 }
 0x217   : > { %v958_v37 = vmul.f32 %v1340_v42, %v942_v47  ;;  %v943_v49 = vsub.f32 %v831_v54, %v1695_v62  ;;  %v1352_v2 = vpop.eup %1351 }
 0x218   : > { %v956_v45 = vmul.f32 %v1342_v14, %v940_v43  ;;  %v941_v17 = vsub.f32 %v829_v35, %v1680_v57  ;;  %v1354_v9 = vpop.eup %1353 }
 0x219   : > { %v974_v38 = vadd.f32 %v958_v37, %v1690_v61  ;;  %v959_v48 = vmul.f32 %v1344_v21, %v943_v49 }
 0x21a   : > { %v972_v27 = vadd.f32 %v956_v45, %v1675_v56  ;;  %v957_v22 = vmul.f32 %v1346_v50, %v941_v17  ;;  %v1207_v60 = vpop.f32.mrb[20].mxu1 }
 0x21b   : > { %990 = vst [vmem:[%s1825_s17 + $0x50] sm:$0xff] %v974_v38  ;;  %v975_v53 = vadd.f32 %v959_v48, %v1695_v62  ;;  %v834_v55 = vmax.f32 %v1207_v60, 0.0  ;;  %v805_v58 = vpop.f32.mrb[21].mxu1 }
 0x21c   : > { %988 = vst [vmem:[%s1825_s17 + $0x40] sm:$0xff] %v972_v27  ;;  %v973_v10 = vadd.f32 %v957_v22, %v1680_v57  ;;  %v832_v18 = vmax.f32 %v805_v58, 0.0  ;;  %v1208_v39 = vpop.f32.mrb[22].mxu1 }
 0x21d   : > { %991 = vst [vmem:[%s1825_s17 + $0x58] sm:$0xff] %v975_v53  ;;  %v946_v61 = vsub.f32 %v834_v55, %v1628_v40  ;;  %v835_v3 = vmax.f32 %v1208_v39, 0.0  ;;  %v808_v56 = vpop.f32.mrb[23].mxu1 }
 0x21e   : > { %989 = vst [vmem:[%s1825_s17 + $0x48] sm:$0xff] %v973_v10  ;;  %v944_v63 = vsub.f32 %v832_v18, %v1598_v30  ;;  %v833_v62 = vmax.f32 %v808_v56, 0.0 }
 0x21f   : > { %v962_v1 = vmul.f32 %v1348_v59, %v946_v61  ;;  %v947_v57 = vsub.f32 %v835_v3, %v1633_v41 }
 0x220   : > { %v960_v4 = vmul.f32 %v1350_v29, %v944_v63  ;;  %v945_v7 = vsub.f32 %v833_v62, %v1603_v31 }
 0x221   : > { %v978_v11 = vadd.f32 %v962_v1, %v1628_v40  ;;  %v963_v16 = vmul.f32 %v1352_v2, %v947_v57 }
 0x222   : > { %v976_v34 = vadd.f32 %v960_v4, %v1598_v30  ;;  %v961_v8 = vmul.f32 %v1354_v9, %v945_v7 }
 0x223   : > { %994 = vst [vmem:[%s1825_s17 + $0x70] sm:$0xff] %v978_v11  ;;  %v979_v44 = vadd.f32 %v963_v16, %v1633_v41 }
 0x224   : > { %992 = vst [vmem:[%s1825_s17 + $0x60] sm:$0xff] %v976_v34  ;;  %v977_v40 = vadd.f32 %v961_v8, %v1603_v31 }
 0x225   : > { %995 = vst [vmem:[%s1825_s17 + $0x78] sm:$0xff] %v979_v44 }
 0x226   : > { %993 = vst [vmem:[%s1825_s17 + $0x68] sm:$0xff] %v977_v40 }
 0x227   : > { %1368 = shalt.err (!%p1365_p3)
}
 0x228   : > { %s1369_s10 = scalar_lea.hbm %s1870_s27, 2048  ;;  %s1373_s13 = scalar_lea.hbm %s1926_s5, 4096 }
 0x229   : > { %p1370_p4 = scmp.ne.s32.totalorder %s1870_s27, %s1369_s10  ;;  %p1374_p9 = scmp.lt.u32.totalorder %s1870_s27, %s1926_s5 }
 0x22a   : > { %p1375_p10 = scmp.lt.u32.totalorder %s1373_s13, %s1369_s10  ;;  %p1377_p12 = scmp.lt.u32.totalorder %s1369_s10, %s1870_s27 }
 0x22b   : > { %p1371_p7 = pnand %p1370_p4, %p1496_p5 }
 0x22c   : > { %p1376_p11 = por %p1375_p10, %p1374_p9 }
 0x22d   : > { %p1372_p8 = pneg %p1371_p7 }
 0x22e   : > { %p1378_p13 = por %p1377_p12, %p1376_p11 }
 0x230   : > { %p1379_p0 = pnand %p1378_p13, %p1372_p8 }
 0x232   : > { %1382 = shalt.err (!%p1379_p0)
}
 0x233   : > { %s1421_s14 = smov 128   ;;  %s1422_s17 = smov 8  }
 0x234   : > { %1225 = dma.vmem_to_hbm [thread:$0]  (%p1496_p5), %s1872_s19, 2048, %s1870_s27, %s1880_s4, %s1421_s14, %s1421_s14, %s1422_s17  }
 0x235 PF: > { %p1231_p1 = scmp.ge.s32.totalorder %s1417_s23, 2  ;;  %s1026_s18 = sand.u32 1, %s1405_s20  }
 0x236   : > { %s1027_s24 = scalar_lea.sflag [#allocation8], %s1026_s18 }
 0x237   : > { %p1228_p2 = pnand %p1231_p1, %p1500_p6 }
 0x239   : > { %1400 = dma.done.wait (!%p1228_p2), %s1027_s24, 2048  }
 0x23a   : > { %1402 = vsyncadd (!%p1228_p2), %s1027_s24, 4294965248  ;;  %p16_p3 = scmp.ge.s32.totalorder %s1483_s25, 4   ;;  %s1929_s20 = smov %s1409_s21 }
 0x23b   : > { %s1930_s21 = smov %s1413_s22  ;;  %s1931_s22 = smov %s1494_s28 }
 0x23c   : > { %s1932_s23 = smov %s1483_s25  ;;  %18 = sbr.rel (!%p16_p3) target bundleno = 5 (0x5), region = 104 }
 0x243   :  { %1032 = vsyncpa [#allocation8], 1 }
 0x244   :  { %1034 = vsyncpa [#allocation8 + $0x1], 1 }

</bundles_post_ra>
